<compile_context>
chip_gen: v6e
topology: v6e:2x2x1
jax: 0.10.0
libtpu: 0.0.40
codegen_flags: <defaults>
</compile_context>

<pallas_src>
import functools

import jax
import jax.numpy as jnp
from jax.experimental import pallas as pl
from jax.experimental.pallas import tpu as pltpu

_SUBLANE = 8
_LANE = 128


def _round_up(n, m):
    return ((n + m - 1) // m) * m


def _fused_mlp_kernel(*refs, acts):
    """Whole-MLP fused kernel.

    refs = (x_ref, w0_ref, b0_ref, w1_ref, b1_ref, ..., o_ref)
      x_ref: [B_pad, D0_pad]      w_i: [Di_pad, Di+1_pad]      b_i: [1, Di+1_pad]
    acts: static tuple of 1 (ReLU) / 2 (Sigmoid), one per layer.
    Padded rows/cols are zero-filled, and padded columns of layer i are
    annihilated by the zero-padded rows of W_{i+1}, so padding is exact.
    """
    x_ref = refs[0]
    o_ref = refs[-1]
    params = refs[1:-1]

    h = x_ref[...]
    for li, act in enumerate(acts):
        w = params[2 * li][...]          # [Din_pad, Dout_pad]
        b = params[2 * li + 1][...]      # [1, Dout_pad]
        h = jnp.dot(h, w, preferred_element_type=jnp.float32) + b  # MXU
        if act == 1:
            h = jnp.maximum(h, 0.0)      # VPU
        elif act == 2:
            h = jax.nn.sigmoid(h)        # EUP (own VLIW slot, ~free vs matmul)
    o_ref[...] = h.astype(o_ref.dtype)


@functools.lru_cache(maxsize=None)
def _build_fused_call(b_pad, dims_pad, acts):
    """Builds the single fused pallas_call for static (padded) shapes."""
    n_layers = len(acts)
    kernel = functools.partial(_fused_mlp_kernel, acts=acts)

    in_specs = [pl.BlockSpec((b_pad, dims_pad[0]), lambda i: (0, 0))]
    for li in range(n_layers):
        din_p, dout_p = dims_pad[li], dims_pad[li + 1]
        in_specs.append(pl.BlockSpec((din_p, dout_p), lambda i: (0, 0)))
        in_specs.append(pl.BlockSpec((1, dout_p), lambda i: (0, 0)))

    return pl.pallas_call(
        kernel,
        out_shape=jax.ShapeDtypeStruct((b_pad, dims_pad[-1]), jnp.float32),
        grid=(1,),
        in_specs=in_specs,
        out_specs=pl.BlockSpec((b_pad, dims_pad[-1]), lambda i: (0, 0)),
        compiler_params=pltpu.CompilerParams(
            dimension_semantics=("arbitrary",)),
    )


@functools.partial(jax.jit, static_argnames=("acts", "batch", "dims"))
def _fused_forward(x, params, *, acts, batch, dims):
    """Jitted end-to-end forward: pad input -> fused kernel -> slice output."""
    b_pad = _round_up(max(batch, _SUBLANE), _SUBLANE)
    dims_pad = tuple(_round_up(d, _LANE) for d in dims)
    x_pad = jnp.zeros((b_pad, dims_pad[0]), jnp.float32)
    x_pad = x_pad.at[:batch, :dims[0]].set(x.astype(jnp.float32))
    out_pad = _build_fused_call(b_pad, dims_pad, acts)(x_pad, *params)
    return out_pad[:batch, :dims[-1]]


class MLP:
    """JAX/Pallas port of the PyTorch MLP(camadas, fun_ativacao) module."""

    def __init__(self, camadas, fun_ativacao, key):
        # torch.nn.Linear-style init: U(-1/sqrt(fan_in), +1/sqrt(fan_in))
        self.weights = []
        self.biases = []
        for i in range(len(camadas) - 1):
            fan_in, fan_out = camadas[i], camadas[i + 1]
            key, kw, kb = jax.random.split(key, 3)
            bound = 1.0 / (fan_in ** 0.5)
            self.weights.append(
                jax.random.uniform(kw, (fan_out, fan_in), jnp.float32,
                                   minval=-bound, maxval=bound))
            self.biases.append(
                jax.random.uniform(kb, (fan_out,), jnp.float32,
                                   minval=-bound, maxval=bound))

        # torch: only codes 1/2 become activations; zip(layers, activations)
        # then runs only the paired (layer, activation) prefixes.
        acts = tuple(a for a in fun_ativacao if a in (1, 2))
        n_run = min(len(self.weights), len(acts))
        self.acts = acts[:n_run]
        self._dims = tuple(camadas[: n_run + 1])

        # Pre-transpose + zero-pad all parameters ONCE (lane-dense layout).
        dims_pad = tuple(_round_up(d, _LANE) for d in self._dims)
        padded = []
        for li in range(n_run):
            w_t = self.weights[li].T                      # [Din, Dout]
            din, dout = w_t.shape
            wp = jnp.zeros((dims_pad[li], dims_pad[li + 1]), jnp.float32)
            wp = wp.at[:din, :dout].set(w_t)
            bp = jnp.zeros((1, dims_pad[li + 1]), jnp.float32)
            bp = bp.at[0, :dout].set(self.biases[li])
            padded.append(wp)
            padded.append(bp)
        self._params = tuple(padded)

    def forward_stacked(self, x):
        """Single [B, Dout] device array (one fused, jitted kernel call)."""
        x = jnp.asarray(x, dtype=jnp.float32)
        if not self.acts:
            return x
        return _fused_forward(x, self._params, acts=self.acts,
                              batch=x.shape[0], dims=self._dims)

    def forward(self, x):
        # Mirrors the torch module's return type: list of per-row tensors,
        # sliced once from the single stacked result.
        out = self.forward_stacked(x)
        return [out[i] for i in range(out.shape[0])]


if __name__ == "__main__":
    key = jax.random.PRNGKey(0)
    key, k_in = jax.random.split(key)

    camadas = [4, 32, 8]          # input 4 -> hidden 32 -> output 8
    fun_ativacao = [1, 2]         # ReLU then Sigmoid
    batch = 2

    mlp = MLP(camadas, fun_ativacao, key)
    x = jax.random.normal(k_in, (batch, camadas[0]), dtype=jnp.float32)

    out = mlp.forward_stacked(x)
    jax.block_until_ready(out)
    rows = mlp.forward(x)          # list-of-rows, matching torch semantics

    # Sanity check vs plain-JAX reference
    ref = x
    for (w, b, act) in zip(mlp.weights, mlp.biases, mlp.acts):
        ref = ref @ w.T + b
        ref = jnp.maximum(ref, 0.0) if act == 1 else jax.nn.sigmoid(ref)
    assert jnp.allclose(out, ref, atol=1e-5, rtol=1e-5)
    assert jnp.allclose(jnp.stack(rows, axis=0), ref, atol=1e-5, rtol=1e-5)

    print("KERNEL_OK")
</pallas_src>

<mosaic_0001>
module attributes {stable_mosaic.version = 11 : i64} {
  func.func @_fused_mlp_kernel(%arg0: i32, %arg1: memref<8x128xf32, #tpu.memory_space<vmem>>, %arg2: memref<128x128xf32, #tpu.memory_space<vmem>>, %arg3: memref<1x128xf32, #tpu.memory_space<vmem>>, %arg4: memref<128x128xf32, #tpu.memory_space<vmem>>, %arg5: memref<1x128xf32, #tpu.memory_space<vmem>>, %arg6: memref<8x128xf32, #tpu.memory_space<vmem>>) attributes {dimension_semantics = [#tpu.dimension_semantics<arbitrary>], iteration_bounds = array<i64: 1>, scalar_prefetch = 0 : i64, scratch_operands = 0 : i64, tpu.core_type = #tpu.core_type<tc>, window_params = [{pipeline_mode = #tpu.pipeline_mode<synchronous>, transform_indices = @transform_0, window_bounds = array<i64: 8, 128>}, {pipeline_mode = #tpu.pipeline_mode<synchronous>, transform_indices = @transform_1, window_bounds = array<i64: 128, 128>}, {pipeline_mode = #tpu.pipeline_mode<synchronous>, transform_indices = @transform_2, window_bounds = array<i64: 1, 128>}, {pipeline_mode = #tpu.pipeline_mode<synchronous>, transform_indices = @transform_3, window_bounds = array<i64: 128, 128>}, {pipeline_mode = #tpu.pipeline_mode<synchronous>, transform_indices = @transform_4, window_bounds = array<i64: 1, 128>}, {pipeline_mode = #tpu.pipeline_mode<synchronous>, transform_indices = @transform_5, window_bounds = array<i64: 8, 128>}]} {
    %c0 = arith.constant 0 : index
    %c0_0 = arith.constant 0 : index
    %0 = vector.load %arg1[%c0, %c0_0] : memref<8x128xf32, #tpu.memory_space<vmem>>, vector<8x128xf32>
    %c0_1 = arith.constant 0 : index
    %c0_2 = arith.constant 0 : index
    %1 = vector.load %arg2[%c0_1, %c0_2] : memref<128x128xf32, #tpu.memory_space<vmem>>, vector<128x128xf32>
    %c0_3 = arith.constant 0 : index
    %c0_4 = arith.constant 0 : index
    %2 = vector.load %arg3[%c0_3, %c0_4] : memref<1x128xf32, #tpu.memory_space<vmem>>, vector<1x128xf32>
    %cst = arith.constant dense<0.000000e+00> : vector<8x128xf32>
    %3 = tpu.matmul %0, %1, %cst {dimension_numbers = #tpu.dot_dimension_numbers<[1], [0], [0], [1], [0, 0, 1, 1], [], []>} : vector<8x128xf32>, vector<128x128xf32>, vector<8x128xf32> -> vector<8x128xf32>
    %4 = vector.broadcast %2 : vector<1x128xf32> to vector<8x128xf32>
    %5 = arith.addf %3, %4 : vector<8x128xf32>
    %cst_5 = arith.constant 0.000000e+00 : f32
    %6 = vector.broadcast %cst_5 : f32 to vector<8x128xf32>
    %7 = arith.maximumf %5, %6 : vector<8x128xf32>
    %c0_6 = arith.constant 0 : index
    %c0_7 = arith.constant 0 : index
    %8 = vector.load %arg4[%c0_6, %c0_7] : memref<128x128xf32, #tpu.memory_space<vmem>>, vector<128x128xf32>
    %c0_8 = arith.constant 0 : index
    %c0_9 = arith.constant 0 : index
    %9 = vector.load %arg5[%c0_8, %c0_9] : memref<1x128xf32, #tpu.memory_space<vmem>>, vector<1x128xf32>
    %cst_10 = arith.constant dense<0.000000e+00> : vector<8x128xf32>
    %10 = tpu.matmul %7, %8, %cst_10 {dimension_numbers = #tpu.dot_dimension_numbers<[1], [0], [0], [1], [0, 0, 1, 1], [], []>} : vector<8x128xf32>, vector<128x128xf32>, vector<8x128xf32> -> vector<8x128xf32>
    %11 = vector.broadcast %9 : vector<1x128xf32> to vector<8x128xf32>
    %12 = arith.addf %10, %11 : vector<8x128xf32>
    %13 = arith.negf %12 : vector<8x128xf32>
    %14 = math.exp %13 : vector<8x128xf32>
    %cst_11 = arith.constant 1.000000e+00 : f32
    %15 = vector.broadcast %cst_11 : f32 to vector<8x128xf32>
    %16 = arith.addf %15, %14 : vector<8x128xf32>
    %17 = arith.divf %15, %16 : vector<8x128xf32>
    %c0_12 = arith.constant 0 : index
    %c0_13 = arith.constant 0 : index
    %18 = vector.load %arg6[%c0_12, %c0_13] : memref<8x128xf32, #tpu.memory_space<vmem>>, vector<8x128xf32>
    tpu.vector_store %arg6[%c0_12, %c0_13], %17 {strides = array<i32>} : memref<8x128xf32, #tpu.memory_space<vmem>>, vector<8x128xf32>,
    return
  }
  func.func @transform_0(%arg0: i32) -> (i32, i32) {
    %c0_i32 = arith.constant 0 : i32
    %c0_i32_0 = arith.constant 0 : i32
    %c0_i32_1 = arith.constant 0 : i32
    return %c0_i32, %c0_i32_0 : i32, i32
  }
  func.func @transform_1(%arg0: i32) -> (i32, i32) {
    %c0_i32 = arith.constant 0 : i32
    %c0_i32_0 = arith.constant 0 : i32
    %c0_i32_1 = arith.constant 0 : i32
    return %c0_i32, %c0_i32_0 : i32, i32
  }
  func.func @transform_2(%arg0: i32) -> (i32, i32) {
    %c0_i32 = arith.constant 0 : i32
    %c0_i32_0 = arith.constant 0 : i32
    %c0_i32_1 = arith.constant 0 : i32
    return %c0_i32, %c0_i32_0 : i32, i32
  }
  func.func @transform_3(%arg0: i32) -> (i32, i32) {
    %c0_i32 = arith.constant 0 : i32
    %c0_i32_0 = arith.constant 0 : i32
    %c0_i32_1 = arith.constant 0 : i32
    return %c0_i32, %c0_i32_0 : i32, i32
  }
  func.func @transform_4(%arg0: i32) -> (i32, i32) {
    %c0_i32 = arith.constant 0 : i32
    %c0_i32_0 = arith.constant 0 : i32
    %c0_i32_1 = arith.constant 0 : i32
    return %c0_i32, %c0_i32_0 : i32, i32
  }
  func.func @transform_5(%arg0: i32) -> (i32, i32) {
    %c0_i32 = arith.constant 0 : i32
    %c0_i32_0 = arith.constant 0 : i32
    %c0_i32_1 = arith.constant 0 : i32
    return %c0_i32, %c0_i32_0 : i32, i32
  }
}

</mosaic_0001>

<bundles_post_ra>
// kernel: _fused_forward.1
= control target key start
LH: loop header
LB: loop body
LE: loop exit
PB: predicated region body
PF: predicated region fallthrough
CT: control target
= control target key end

     0   :  { %10 = vsyncpa [#allocation3], 0  ;;  %s498_s0 = inlined_call_operand.vmem [shape: f32[8,128], index: 0, kind: input, shape index: {}]   ;;  %s499_s1 = inlined_call_operand.hbm [shape: f32[128,128], index: 1, kind: input, shape index: {}]   ;;  %s500_s2 = inlined_call_operand.vmem [shape: f32[1,128], index: 2, kind: input, shape index: {}]   ;;  %s501_s3 = inlined_call_operand.hbm [shape: f32[128,128], index: 3, kind: input, shape index: {}]   ;;  %s502_s4 = inlined_call_operand.vmem [shape: f32[1,128], index: 4, kind: input, shape index: {}]   ;;  %s503_s5 = inlined_call_operand.vmem [shape: f32[8,128], index: 5, kind: output, shape index: {}]  }
   0x1   :  { %11 = vsyncpa [#allocation5], 0  ;;  %s410_s18 = smov [#allocation2]  }
   0x2   :  { %s19_s19 = sshll.u32 %s410_s18, 4  ;;  %s20_s19 = int_to_ptr.vmem [resolvable:$true] %s19_s19 }
   0x3   :  { %s374_s20 = scalar_lea.vmem %s20_s19, 2048  ;;  %p379_p1 = scmp.lt.s32.totalorder %s20_s19, %s20_s19 }
   0x4   :  { %p375_p0 = scmp.ne.s32.totalorder %s20_s19, %s374_s20  ;;  %p380_p2 = scmp.lt.s32.totalorder %s374_s20, %s374_s20 }
   0x6   :  { %p381_p3 = por %p380_p2, %p379_p1 }
   0x8   :  { %p382_p4 = pnand %p381_p3, %p375_p0 }
   0xa   :  { %385 = shalt.err (!%p382_p4)
}
   0xb   :  { %s411_s21 = smov 128   ;;  %s412_s22 = smov 8  }
   0xc   :  { %25 = dma.hbm_to_vmem [thread:$0]  %s499_s1, 2048, %s20_s19, [#allocation3], %s411_s21, %s411_s21, %s412_s22  }
   0xd   :  { %s413_s25 = smov [#allocation4]  }
   0xe   :  { %s33_s26 = sshll.u32 %s413_s25, 4  ;;  %s34_s26 = int_to_ptr.vmem [resolvable:$true] %s33_s26 }
   0xf   :  { %s394_s27 = scalar_lea.vmem %s34_s26, 2048  ;;  %p399_p6 = scmp.lt.s32.totalorder %s34_s26, %s34_s26 }
  0x10   :  { %p395_p5 = scmp.ne.s32.totalorder %s34_s26, %s394_s27  ;;  %p400_p7 = scmp.lt.s32.totalorder %s394_s27, %s394_s27 }
  0x12   :  { %p401_p8 = por %p400_p7, %p399_p6 }
  0x14   :  { %p402_p9 = pnand %p401_p8, %p395_p5 }
  0x16   :  { %405 = shalt.err (!%p402_p9)
}
  0x17   :  { %39 = dma.hbm_to_vmem [thread:$0]  %s501_s3, 2048, %s34_s26, [#allocation5], %s411_s21, %s411_s21, %s412_s22  }
  0x18   :  { %406 = dma.done.wait [#allocation3], 2048  }
  0x19   :  { %407 = vsyncadd [#allocation3], 4294965248 }
  0x1a   :  { %408 = dma.done.wait [#allocation5], 2048  }
  0x1b   :  { %409 = vsyncadd [#allocation5], 4294965248  ;;  %v414_v0 = vmov 0.0   ;;  %vm415_vm0 = vmmov 0   ;;  %v64_v1 = vld [vmem:[#allocation2 + $0x78] sm:$0xff]  ;;  %v63_v2 = vld [vmem:[#allocation2 + $0x70] sm:$0xff] }
  0x1c   :  { %286 = vmatprep.subr.mxu0 %v414_v0  ;;  %318 = vmatprep.mubr.msk.f32.mxu0 %vm415_vm0, %v414_v0  ;;  %v62_v3 = vld [vmem:[#allocation2 + $0x68] sm:$0xff]  ;;  %v61_v4 = vld [vmem:[#allocation2 + $0x60] sm:$0xff]  ;;  %v158_v5 = vld [vmem:[#allocation4 + $0x78] sm:$0xff] }
  0x1d   :  { %321 = vmatprep.subr.mxu1 %v414_v0  ;;  %353 = vmatprep.mubr.msk.f32.mxu1 %vm415_vm0, %v414_v0  ;;  %v60_v6 = vld [vmem:[#allocation2 + $0x58] sm:$0xff]  ;;  %v157_v7 = vld [vmem:[#allocation4 + $0x70] sm:$0xff]  ;;  %v156_v8 = vld [vmem:[#allocation4 + $0x68] sm:$0xff] }
  0x1e   :  { %287 = vmatpush3.msra.mxu0 %v64_v1  ;;  %322 = vmatpush3.msra.mxu1 %v158_v5  ;;  %v59_v9 = vld [vmem:[#allocation2 + $0x50] sm:$0xff]  ;;  %v155_v10 = vld [vmem:[#allocation4 + $0x60] sm:$0xff]  ;;  %v58_v11 = vld [vmem:[#allocation2 + $0x48] sm:$0xff] }
  0x1f   :  { %288 = vmatprep.subr.mxu0 %v414_v0  ;;  %323 = vmatprep.subr.mxu1 %v414_v0  ;;  %v154_v12 = vld [vmem:[#allocation4 + $0x58] sm:$0xff]  ;;  %v57_v13 = vld [vmem:[#allocation2 + $0x40] sm:$0xff]  ;;  %v153_v14 = vld [vmem:[#allocation4 + $0x50] sm:$0xff] }
  0x20   :  { %289 = vmatpush3.msra.mxu0 %v63_v2  ;;  %324 = vmatpush3.msra.mxu1 %v157_v7  ;;  %v56_v15 = vld [vmem:[#allocation2 + $0x38] sm:$0xff]  ;;  %v152_v16 = vld [vmem:[#allocation4 + $0x48] sm:$0xff]  ;;  %v55_v17 = vld [vmem:[#allocation2 + $0x30] sm:$0xff] }
  0x21   :  { %290 = vmatprep.subr.mxu0 %v414_v0  ;;  %325 = vmatprep.subr.mxu1 %v414_v0  ;;  %v151_v18 = vld [vmem:[#allocation4 + $0x40] sm:$0xff]  ;;  %v54_v19 = vld [vmem:[#allocation2 + $0x28] sm:$0xff]  ;;  %v150_v20 = vld [vmem:[#allocation4 + $0x38] sm:$0xff] }
  0x22   :  { %291 = vmatpush3.msra.mxu0 %v62_v3  ;;  %326 = vmatpush3.msra.mxu1 %v156_v8  ;;  %v53_v21 = vld [vmem:[#allocation2 + $0x20] sm:$0xff]  ;;  %v149_v22 = vld [vmem:[#allocation4 + $0x30] sm:$0xff]  ;;  %v52_v23 = vld [vmem:[#allocation2 + $0x18] sm:$0xff] }
  0x23   :  { %292 = vmatprep.subr.mxu0 %v414_v0  ;;  %327 = vmatprep.subr.mxu1 %v414_v0  ;;  %v148_v24 = vld [vmem:[#allocation4 + $0x28] sm:$0xff]  ;;  %v51_v25 = vld [vmem:[#allocation2 + $0x10] sm:$0xff]  ;;  %v147_v26 = vld [vmem:[#allocation4 + $0x20] sm:$0xff] }
  0x24   :  { %293 = vmatpush3.msra.mxu0 %v61_v4  ;;  %328 = vmatpush3.msra.mxu1 %v155_v10  ;;  %v50_v27 = vld [vmem:[#allocation2 + $0x8] sm:$0xff]  ;;  %v146_v28 = vld [vmem:[#allocation4 + $0x18] sm:$0xff]  ;;  %v49_v29 = vld [vmem:[#allocation2] sm:$0xff] }
  0x25   :  { %294 = vmatprep.subr.mxu0 %v414_v0  ;;  %329 = vmatprep.subr.mxu1 %v414_v0  ;;  %v48_v30 = vld [vmem:[%s498_s0] sm:$0xff]  ;;  %v145_v31 = vld [vmem:[#allocation4 + $0x10] sm:$0xff]  ;;  %v144_v32 = vld [vmem:[#allocation4 + $0x8] sm:$0xff] }
  0x26   :  { %295 = vmatpush3.msra.mxu0 %v60_v6  ;;  %330 = vmatpush3.msra.mxu1 %v154_v12  ;;  %v143_v33 = vld [vmem:[#allocation4] sm:$0xff] }
  0x27   :  { %296 = vmatprep.subr.mxu0 %v414_v0  ;;  %331 = vmatprep.subr.mxu1 %v414_v0  ;;  %v249_v34 = vld [vmem:[%s500_s2] ss:$0 sm:$0xff] }
  0x28   :  { %297 = vmatpush3.msra.mxu0 %v59_v9  ;;  %332 = vmatpush3.msra.mxu1 %v153_v14  ;;  %v250_v39 = vld [vmem:[%s502_s4] ss:$0 sm:$0xff] }
  0x29   :  { %298 = vmatprep.subr.mxu0 %v414_v0  ;;  %333 = vmatprep.subr.mxu1 %v414_v0 }
  0x2a   :  { %299 = vmatpush3.msra.mxu0 %v58_v11  ;;  %334 = vmatpush3.msra.mxu1 %v152_v16 }
  0x2b   :  { %300 = vmatprep.subr.mxu0 %v414_v0  ;;  %335 = vmatprep.subr.mxu1 %v414_v0 }
  0x2c   :  { %301 = vmatpush3.msra.mxu0 %v57_v13  ;;  %336 = vmatpush3.msra.mxu1 %v151_v18 }
  0x2d   :  { %302 = vmatprep.subr.mxu0 %v414_v0  ;;  %337 = vmatprep.subr.mxu1 %v414_v0 }
  0x2e   :  { %303 = vmatpush3.msra.mxu0 %v56_v15  ;;  %338 = vmatpush3.msra.mxu1 %v150_v20 }
  0x2f   :  { %304 = vmatprep.subr.mxu0 %v414_v0  ;;  %339 = vmatprep.subr.mxu1 %v414_v0 }
  0x30   :  { %305 = vmatpush3.msra.mxu0 %v55_v17  ;;  %340 = vmatpush3.msra.mxu1 %v149_v22 }
  0x31   :  { %306 = vmatprep.subr.mxu0 %v414_v0  ;;  %341 = vmatprep.subr.mxu1 %v414_v0 }
  0x32   :  { %307 = vmatpush3.msra.mxu0 %v54_v19  ;;  %342 = vmatpush3.msra.mxu1 %v148_v24 }
  0x33   :  { %308 = vmatprep.subr.mxu0 %v414_v0  ;;  %343 = vmatprep.subr.mxu1 %v414_v0 }
  0x34   :  { %309 = vmatpush3.msra.mxu0 %v53_v21  ;;  %344 = vmatpush3.msra.mxu1 %v147_v26 }
  0x35   :  { %310 = vmatprep.subr.mxu0 %v414_v0  ;;  %345 = vmatprep.subr.mxu1 %v414_v0 }
  0x36   :  { %311 = vmatpush3.msra.mxu0 %v52_v23  ;;  %346 = vmatpush3.msra.mxu1 %v146_v28 }
  0x37   :  { %312 = vmatprep.subr.mxu0 %v414_v0  ;;  %347 = vmatprep.subr.mxu1 %v414_v0 }
  0x38   :  { %313 = vmatpush3.msra.mxu0 %v51_v25  ;;  %348 = vmatpush3.msra.mxu1 %v145_v31 }
  0x39   :  { %314 = vmatprep.subr.mxu0 %v414_v0  ;;  %349 = vmatprep.subr.mxu1 %v414_v0 }
  0x3a   :  { %315 = vmatpush3.msra.mxu0 %v50_v27  ;;  %350 = vmatpush3.msra.mxu1 %v144_v32 }
  0x3b   :  { %316 = vmatprep.subr.mxu0 %v414_v0  ;;  %351 = vmatprep.subr.mxu1 %v414_v0 }
  0x3c   :  { %317 = vmatpush3.msra.mxu0 %v49_v29  ;;  %352 = vmatpush3.msra.mxu1 %v143_v33 }
  0x3d   :  { %319 = vmatmul.mubr.f32.vlgmr.msra.gmra.mxu0 %v48_v30 }
  0xfd   :  { %v138_v35 = vpop.f32.mrf.mxu0 }
  0xfe   :  { %v139_v36 = vadd.f32 %v249_v34, %v138_v35 }
  0xff   :  { %v320_v37 = vpop.f32.mrf.mxu0 }
 0x100   :  { %v142_v38 = vmax.f32 %v139_v36, 0.0 }
 0x102   :  { %354 = vmatmul.mubr.f32.vlgmr.msra.gmra.mxu1 %v142_v38 }
 0x1c2   :  { %v232_v40 = vpop.f32.mrf.mxu1 }
 0x1c3   :  { %v233_v41 = vadd.f32 %v250_v39, %v232_v40 }
 0x1c4   :  { %v355_v42 = vpop.f32.mrf.mxu1 }
 0x1c5   :  { %v251_v43 = vmul.f32 -1.442695, %v233_v41 }
 0x1c7   :  { %362 = vpow2.f32 %v251_v43 }
 0x1d4   :  { %v363_v44 = vpop.eup %362 }
 0x1d5   :  { %v239_v45 = vadd.f32 1.0, %v363_v44 }
 0x1d7   :  { %364 = vrcp.f32 %v239_v45 }
 0x1e4   :  { %v365_v46 = vpop.eup %364 }
 0x1e5   :  { %242 = vst [vmem:[%s503_s5] sm:$0xff] %v365_v46 }
 0x1e6   :  { %247 = vsyncpa [#allocation3], 1 }
 0x1e7   :  { %248 = vsyncpa [#allocation5], 1 }

</bundles_post_ra>
